<compile_context>
chip_gen: v6e
topology: v6e:2x2x1
jax: 0.10.0
libtpu: 0.0.40
codegen_flags: <defaults>
</compile_context>

<pallas_src>
import functools

import jax
import jax.numpy as jnp
from jax.experimental import pallas as pl
from jax.experimental.pallas import tpu as pltpu


def _round_up(x, m):
    return ((x + m - 1) // m) * m


def actor_kernel(obs_ref,
                 w1_ref, b1_ref,
                 w2_ref, b2_ref,
                 wh_ref, bh_ref,
                 out_ref, *, act_dim):
    # fc1 + relu  (bf16 MXU operands, f32 accumulation, f32 elementwise)
    x = jnp.dot(obs_ref[...].astype(jnp.bfloat16), w1_ref[...],
                preferred_element_type=jnp.float32)
    x = jnp.maximum(x + b1_ref[...], 0.0)

    # fc2 + relu
    x = jnp.dot(x.astype(jnp.bfloat16), w2_ref[...],
                preferred_element_type=jnp.float32)
    x = jnp.maximum(x + b2_ref[...], 0.0)

    # fused heads: columns [0, act_dim) = mean, [act_dim, 2*act_dim) = log_std,
    # remaining columns are zero padding for a 128-lane-dense output.
    head = jnp.dot(x.astype(jnp.bfloat16), wh_ref[...],
                   preferred_element_type=jnp.float32)
    head = head + bh_ref[...]

    # clamp(-20, 2) applies only to the log_std columns (padding columns are
    # sliced away in the wrapper, so clipping them too is harmless).
    col = jax.lax.broadcasted_iota(jnp.int32, head.shape, dimension=1)
    head = jnp.where(col >= act_dim, jnp.clip(head, -20.0, 2.0), head)

    out_ref[...] = head.astype(out_ref.dtype)


def prepare_actor_params(params, act_dim):
    """Fuse the two heads, pad the fused head to a 128-lane multiple, and cast
    matmul weights to bf16 (biases stay f32). Do this once, offline."""
    wh = jnp.concatenate([params["wm"], params["ws"]], axis=1)   # (H, 2A)
    bh = jnp.concatenate([params["bm"], params["bs"]], axis=1)   # (1, 2A)
    head_pad = _round_up(max(2 * act_dim, 128), 128)
    pad = head_pad - 2 * act_dim
    wh = jnp.pad(wh, ((0, 0), (0, pad)))
    bh = jnp.pad(bh, ((0, 0), (0, pad)))
    return dict(
        w1=params["w1"].astype(jnp.bfloat16), b1=params["b1"],
        w2=params["w2"].astype(jnp.bfloat16), b2=params["b2"],
        wh=wh.astype(jnp.bfloat16),           bh=bh,
    ), head_pad


def actor_forward(obs, prepared, act_dim, head_pad):
    """obs: (B, obs_dim) float32.  Returns (mean, log_std), each (B, act_dim) f32."""
    B, obs_dim = obs.shape
    H = prepared["w1"].shape[1]

    # Batch tile: multiple of 8 sublanes; large tiles amortize per-step overhead.
    TB = min(512, _round_up(B, 8))
    Bp = _round_up(B, TB)
    if Bp != B:
        obs = jnp.pad(obs, ((0, Bp - B), (0, 0)))
    grid = (pl.cdiv(Bp, TB),)

    w1, b1 = prepared["w1"], prepared["b1"]
    w2, b2 = prepared["w2"], prepared["b2"]
    wh, bh = prepared["wh"], prepared["bh"]

    # Weights/biases stay VMEM-resident across batch tiles (constant block index).
    resident = lambda a: pl.BlockSpec(a.shape, lambda i: tuple(0 for _ in a.shape))
    in_specs = [
        pl.BlockSpec((TB, obs_dim), lambda i: (i, 0)),
        resident(w1), resident(b1),
        resident(w2), resident(b2),
        resident(wh), resident(bh),
    ]
    out_specs = pl.BlockSpec((TB, head_pad), lambda i: (i, 0))

    flops = 2 * B * (obs_dim * H + H * H + H * 2 * act_dim)
    bytes_accessed = (4 * Bp * obs_dim
                      + 2 * (obs_dim * H + H * H + H * head_pad)   # bf16 weights
                      + 4 * (H + H + head_pad)                     # f32 biases
                      + 4 * Bp * head_pad)                         # f32 output
    cost = pl.CostEstimate(flops=flops, transcendentals=0,
                           bytes_accessed=bytes_accessed)

    out = pl.pallas_call(
        functools.partial(actor_kernel, act_dim=act_dim),
        out_shape=jax.ShapeDtypeStruct((Bp, head_pad), jnp.float32),
        grid=grid,
        in_specs=in_specs,
        out_specs=out_specs,
        compiler_params=pltpu.CompilerParams(
            dimension_semantics=("parallel",)),   # shard batch across TCs on v7x
        cost_estimate=cost,
    )(obs, w1, b1, w2, b2, wh, bh)

    mean = out[:B, :act_dim]
    log_std = out[:B, act_dim:2 * act_dim]
    return mean, log_std


def init_actor_params(key, obs_dim, act_dim, hidden_dim):
    """Deterministic init mimicking PyTorch nn.Linear (uniform +/- 1/sqrt(fan_in))."""
    def linear(k, fan_in, fan_out):
        kw, kb = jax.random.split(k)
        bound = 1.0 / jnp.sqrt(fan_in)
        w = jax.random.uniform(kw, (fan_in, fan_out), jnp.float32, -bound, bound)
        b = jax.random.uniform(kb, (1, fan_out), jnp.float32, -bound, bound)
        return w, b

    k1, k2, k3, k4 = jax.random.split(key, 4)
    w1, b1 = linear(k1, obs_dim, hidden_dim)
    w2, b2 = linear(k2, hidden_dim, hidden_dim)
    wm, bm = linear(k3, hidden_dim, act_dim)
    ws, bs = linear(k4, hidden_dim, act_dim)
    return dict(w1=w1, b1=b1, w2=w2, b2=b2, wm=wm, bm=bm, ws=ws, bs=bs)


def actor_forward_ref(obs, prepared, act_dim):
    """Pure-JAX reference using the same bf16 matmul operands / f32 accumulation."""
    def mm(a, w):
        return jnp.dot(a.astype(jnp.bfloat16), w, preferred_element_type=jnp.float32)
    x = jnp.maximum(mm(obs, prepared["w1"]) + prepared["b1"], 0.0)
    x = jnp.maximum(mm(x, prepared["w2"]) + prepared["b2"], 0.0)
    head = mm(x, prepared["wh"]) + prepared["bh"]
    mean = head[:, :act_dim]
    log_std = jnp.clip(head[:, act_dim:2 * act_dim], -20.0, 2.0)
    return mean, log_std


def actor_forward_ref_f32(obs, p):
    x = jnp.maximum(obs @ p["w1"] + p["b1"], 0.0)
    x = jnp.maximum(x @ p["w2"] + p["b2"], 0.0)
    mean = x @ p["wm"] + p["bm"]
    log_std = jnp.clip(x @ p["ws"] + p["bs"], -20.0, 2.0)
    return mean, log_std


if __name__ == "__main__":
    obs_dim, act_dim, hidden_dim = 16, 4, 32
    batch = 8

    key = jax.random.PRNGKey(0)
    k_params, k_obs = jax.random.split(key)
    params = init_actor_params(k_params, obs_dim, act_dim, hidden_dim)
    obs = jax.random.normal(k_obs, (batch, obs_dim), jnp.float32)

    prepared, head_pad = prepare_actor_params(params, act_dim)

    mean, log_std = actor_forward(obs, prepared, act_dim, head_pad)
    jax.block_until_ready((mean, log_std))

    # correctness: tight check vs. bf16-operand reference, loose vs. full-f32 math
    mean_r, log_std_r = actor_forward_ref(obs, prepared, act_dim)
    assert jnp.allclose(mean, mean_r, atol=1e-3, rtol=1e-3)
    assert jnp.allclose(log_std, log_std_r, atol=1e-3, rtol=1e-3)

    mean_f, log_std_f = actor_forward_ref_f32(obs, params)
    assert jnp.allclose(mean, mean_f, atol=5e-2, rtol=5e-2)
    assert jnp.allclose(log_std, log_std_f, atol=5e-2, rtol=5e-2)

    print("KERNEL_OK")
</pallas_src>

<mosaic_0001>
module attributes {stable_mosaic.version = 11 : i64} {
  func.func @actor_kernel(%arg0: i32, %arg1: memref<8x16xf32, #tpu.memory_space<vmem>>, %arg2: memref<16x32xbf16, #tpu.memory_space<vmem>>, %arg3: memref<1x32xf32, #tpu.memory_space<vmem>>, %arg4: memref<32x32xbf16, #tpu.memory_space<vmem>>, %arg5: memref<1x32xf32, #tpu.memory_space<vmem>>, %arg6: memref<32x128xbf16, #tpu.memory_space<vmem>>, %arg7: memref<1x128xf32, #tpu.memory_space<vmem>>, %arg8: memref<8x128xf32, #tpu.memory_space<vmem>>) attributes {dimension_semantics = [#tpu.dimension_semantics<parallel>], iteration_bounds = array<i64: 1>, scalar_prefetch = 0 : i64, scratch_operands = 0 : i64, tpu.core_type = #tpu.core_type<tc>, window_params = [{transform_indices = @transform_0, window_bounds = array<i64: 8, 16>}, {pipeline_mode = #tpu.pipeline_mode<synchronous>, transform_indices = @transform_1, window_bounds = array<i64: 16, 32>}, {pipeline_mode = #tpu.pipeline_mode<synchronous>, transform_indices = @transform_2, window_bounds = array<i64: 1, 32>}, {pipeline_mode = #tpu.pipeline_mode<synchronous>, transform_indices = @transform_3, window_bounds = array<i64: 32, 32>}, {pipeline_mode = #tpu.pipeline_mode<synchronous>, transform_indices = @transform_4, window_bounds = array<i64: 1, 32>}, {pipeline_mode = #tpu.pipeline_mode<synchronous>, transform_indices = @transform_5, window_bounds = array<i64: 32, 128>}, {pipeline_mode = #tpu.pipeline_mode<synchronous>, transform_indices = @transform_6, window_bounds = array<i64: 1, 128>}, {transform_indices = @transform_7, window_bounds = array<i64: 8, 128>}]} {
    %c0 = arith.constant 0 : index
    %c0_0 = arith.constant 0 : index
    %0 = vector.load %arg1[%c0, %c0_0] : memref<8x16xf32, #tpu.memory_space<vmem>>, vector<8x16xf32>
    %1 = arith.truncf %0 : vector<8x16xf32> to vector<8x16xbf16>
    %c0_1 = arith.constant 0 : index
    %c0_2 = arith.constant 0 : index
    %2 = vector.load %arg2[%c0_1, %c0_2] : memref<16x32xbf16, #tpu.memory_space<vmem>>, vector<16x32xbf16>
    %cst = arith.constant dense<0.000000e+00> : vector<8x32xf32>
    %3 = tpu.matmul %1, %2, %cst {dimension_numbers = #tpu.dot_dimension_numbers<[1], [0], [0], [1], [0, 0, 1, 1], [], []>} : vector<8x16xbf16>, vector<16x32xbf16>, vector<8x32xf32> -> vector<8x32xf32>
    %c0_3 = arith.constant 0 : index
    %c0_4 = arith.constant 0 : index
    %4 = vector.load %arg3[%c0_3, %c0_4] : memref<1x32xf32, #tpu.memory_space<vmem>>, vector<1x32xf32>
    %5 = vector.broadcast %4 : vector<1x32xf32> to vector<8x32xf32>
    %6 = arith.addf %3, %5 : vector<8x32xf32>
    %cst_5 = arith.constant 0.000000e+00 : f32
    %7 = vector.broadcast %cst_5 : f32 to vector<8x32xf32>
    %8 = arith.maximumf %6, %7 : vector<8x32xf32>
    %9 = arith.truncf %8 : vector<8x32xf32> to vector<8x32xbf16>
    %c0_6 = arith.constant 0 : index
    %c0_7 = arith.constant 0 : index
    %10 = vector.load %arg4[%c0_6, %c0_7] : memref<32x32xbf16, #tpu.memory_space<vmem>>, vector<32x32xbf16>
    %cst_8 = arith.constant dense<0.000000e+00> : vector<8x32xf32>
    %11 = tpu.matmul %9, %10, %cst_8 {dimension_numbers = #tpu.dot_dimension_numbers<[1], [0], [0], [1], [0, 0, 1, 1], [], []>} : vector<8x32xbf16>, vector<32x32xbf16>, vector<8x32xf32> -> vector<8x32xf32>
    %c0_9 = arith.constant 0 : index
    %c0_10 = arith.constant 0 : index
    %12 = vector.load %arg5[%c0_9, %c0_10] : memref<1x32xf32, #tpu.memory_space<vmem>>, vector<1x32xf32>
    %13 = vector.broadcast %12 : vector<1x32xf32> to vector<8x32xf32>
    %14 = arith.addf %11, %13 : vector<8x32xf32>
    %cst_11 = arith.constant 0.000000e+00 : f32
    %15 = vector.broadcast %cst_11 : f32 to vector<8x32xf32>
    %16 = arith.maximumf %14, %15 : vector<8x32xf32>
    %17 = arith.truncf %16 : vector<8x32xf32> to vector<8x32xbf16>
    %c0_12 = arith.constant 0 : index
    %c0_13 = arith.constant 0 : index
    %18 = vector.load %arg6[%c0_12, %c0_13] : memref<32x128xbf16, #tpu.memory_space<vmem>>, vector<32x128xbf16>
    %cst_14 = arith.constant dense<0.000000e+00> : vector<8x128xf32>
    %19 = tpu.matmul %17, %18, %cst_14 {dimension_numbers = #tpu.dot_dimension_numbers<[1], [0], [0], [1], [0, 0, 1, 1], [], []>} : vector<8x32xbf16>, vector<32x128xbf16>, vector<8x128xf32> -> vector<8x128xf32>
    %c0_15 = arith.constant 0 : index
    %c0_16 = arith.constant 0 : index
    %20 = vector.load %arg7[%c0_15, %c0_16] : memref<1x128xf32, #tpu.memory_space<vmem>>, vector<1x128xf32>
    %21 = vector.broadcast %20 : vector<1x128xf32> to vector<8x128xf32>
    %22 = arith.addf %19, %21 : vector<8x128xf32>
    %23 = tpu.iota {dimensions = array<i32: 1>} : vector<8x128xi32>
    %c4_i32 = arith.constant 4 : i32
    %24 = vector.broadcast %c4_i32 : i32 to vector<8x128xi32>
    %25 = arith.cmpi sge, %23, %24 : vector<8x128xi32>
    %cst_17 = arith.constant -2.000000e+01 : f32
    %cst_18 = arith.constant 2.000000e+00 : f32
    %26 = vector.broadcast %cst_17 : f32 to vector<8x128xf32>
    %27 = arith.maximumf %26, %22 : vector<8x128xf32>
    %28 = vector.broadcast %cst_18 : f32 to vector<8x128xf32>
    %29 = arith.minimumf %28, %27 : vector<8x128xf32>
    %30 = arith.select %25, %29, %22 : vector<8x128xi1>, vector<8x128xf32>
    %c0_19 = arith.constant 0 : index
    %c0_20 = arith.constant 0 : index
    %31 = vector.load %arg8[%c0_19, %c0_20] : memref<8x128xf32, #tpu.memory_space<vmem>>, vector<8x128xf32>
    tpu.vector_store %arg8[%c0_19, %c0_20], %30 {strides = array<i32>} : memref<8x128xf32, #tpu.memory_space<vmem>>, vector<8x128xf32>,
    return
  }
  func.func @transform_0(%arg0: i32) -> (i32, i32) {
    %c0_i32 = arith.constant 0 : i32
    %c0_i32_0 = arith.constant 0 : i32
    return %arg0, %c0_i32 : i32, i32
  }
  func.func @transform_1(%arg0: i32) -> (i32, i32) {
    %c0_i32 = arith.constant 0 : i32
    %c0_i32_0 = arith.constant 0 : i32
    %c0_i32_1 = arith.constant 0 : i32
    return %c0_i32, %c0_i32_0 : i32, i32
  }
  func.func @transform_2(%arg0: i32) -> (i32, i32) {
    %c0_i32 = arith.constant 0 : i32
    %c0_i32_0 = arith.constant 0 : i32
    %c0_i32_1 = arith.constant 0 : i32
    return %c0_i32, %c0_i32_0 : i32, i32
  }
  func.func @transform_3(%arg0: i32) -> (i32, i32) {
    %c0_i32 = arith.constant 0 : i32
    %c0_i32_0 = arith.constant 0 : i32
    %c0_i32_1 = arith.constant 0 : i32
    return %c0_i32, %c0_i32_0 : i32, i32
  }
  func.func @transform_4(%arg0: i32) -> (i32, i32) {
    %c0_i32 = arith.constant 0 : i32
    %c0_i32_0 = arith.constant 0 : i32
    %c0_i32_1 = arith.constant 0 : i32
    return %c0_i32, %c0_i32_0 : i32, i32
  }
  func.func @transform_5(%arg0: i32) -> (i32, i32) {
    %c0_i32 = arith.constant 0 : i32
    %c0_i32_0 = arith.constant 0 : i32
    %c0_i32_1 = arith.constant 0 : i32
    return %c0_i32, %c0_i32_0 : i32, i32
  }
  func.func @transform_6(%arg0: i32) -> (i32, i32) {
    %c0_i32 = arith.constant 0 : i32
    %c0_i32_0 = arith.constant 0 : i32
    %c0_i32_1 = arith.constant 0 : i32
    return %c0_i32, %c0_i32_0 : i32, i32
  }
  func.func @transform_7(%arg0: i32) -> (i32, i32) {
    %c0_i32 = arith.constant 0 : i32
    %c0_i32_0 = arith.constant 0 : i32
    return %arg0, %c0_i32 : i32, i32
  }
}

</mosaic_0001>

<bundles_post_ra>
// kernel: tpu_custom_call.1
= control target key start
LH: loop header
LB: loop body
LE: loop exit
PB: predicated region body
PF: predicated region fallthrough
CT: control target
= control target key end

     0   :  { %12 = vsyncpa [#allocation3], 0  ;;  %s548_s0 = inlined_call_operand.hbm [shape: f32[8,16], index: 0, kind: input, shape index: {}]   ;;  %s549_s1 = inlined_call_operand.hbm [shape: bf16[16,32], index: 1, kind: input, shape index: {}]   ;;  %s550_s2 = inlined_call_operand.vmem [shape: f32[1,32], index: 2, kind: input, shape index: {}]   ;;  %s551_s3 = inlined_call_operand.hbm [shape: bf16[32,32], index: 3, kind: input, shape index: {}]   ;;  %s552_s4 = inlined_call_operand.vmem [shape: f32[1,32], index: 4, kind: input, shape index: {}]   ;;  %s553_s5 = inlined_call_operand.hbm [shape: bf16[32,128], index: 5, kind: input, shape index: {}]   ;;  %s554_s6 = inlined_call_operand.vmem [shape: f32[1,128], index: 6, kind: input, shape index: {}]   ;;  %s555_s7 = inlined_call_operand.hbm [shape: f32[8,128], index: 7, kind: output, shape index: {}]  }
   0x1   :  { %13 = vsyncpa [#allocation6], 0 }
   0x2   :  { %14 = vsyncpa [#allocation9], 0 }
   0x3   :  { %15 = vsyncpa [#allocation4], 0  ;;  %s466_s24 = smov [#allocation5]  }
   0x4   :  { %s31_s25 = sshll.u32 %s466_s24, 4  ;;  %s32_s25 = int_to_ptr.vmem [resolvable:$true] %s31_s25 }
   0x5   :  { %s366_s26 = scalar_lea.vmem %s32_s25, 128  ;;  %p371_p1 = scmp.lt.s32.totalorder %s32_s25, %s32_s25 }
   0x6   :  { %p367_p0 = scmp.ne.s32.totalorder %s32_s25, %s366_s26  ;;  %p372_p2 = scmp.lt.s32.totalorder %s366_s26, %s366_s26 }
   0x8   :  { %p373_p3 = por %p372_p2, %p371_p1 }
   0xa   :  { %p374_p4 = pnand %p373_p3, %p367_p0 }
   0xc   :  { %377 = shalt.err (!%p374_p4)
}
   0xd   :  { %s467_s27 = smov 64   ;;  %s468_s28 = smov 4  }
   0xe   :  { %37 = dma.hbm_to_vmem [thread:$0]  %s549_s1, 128, %s32_s25, [#allocation6], %s467_s27, %s467_s27, %s468_s28  }
   0xf   :  { %s469_s8 = smov [#allocation2]   ;;  %s470_s10 = smov [#allocation7]  }
  0x10   :  { %s22_s9 = sshll.u32 %s469_s8, 4  ;;  %s45_s11 = sshll.u32 %s470_s10, 4  ;;  %s23_s9 = int_to_ptr.vmem [resolvable:$true] %s22_s9  ;;  %s46_s11 = int_to_ptr.vmem [resolvable:$true] %s45_s11 }
  0x11   :  { %s386_s12 = scalar_lea.vmem %s23_s9, 128  ;;  %p391_p6 = scmp.lt.s32.totalorder %s23_s9, %s23_s9 }
  0x12   :  { %p387_p5 = scmp.ne.s32.totalorder %s23_s9, %s386_s12  ;;  %p392_p7 = scmp.lt.s32.totalorder %s386_s12, %s386_s12 }
  0x14   :  { %p393_p8 = por %p392_p7, %p391_p6 }
  0x16   :  { %p394_p9 = pnand %p393_p8, %p387_p5 }
  0x18   :  { %397 = shalt.err (!%p394_p9)
}
  0x19   :  { %25 = dma.hbm_to_vmem [thread:$0]  %s548_s0, 128, %s23_s9, [#allocation3]  }
  0x1a   :  { %s406_s15 = scalar_lea.vmem %s46_s11, 256  ;;  %p411_p11 = scmp.lt.s32.totalorder %s46_s11, %s46_s11 }
  0x1b   :  { %p407_p10 = scmp.ne.s32.totalorder %s46_s11, %s406_s15  ;;  %p412_p12 = scmp.lt.s32.totalorder %s406_s15, %s406_s15 }
  0x1d   :  { %p413_p13 = por %p412_p12, %p411_p11 }
  0x1f   :  { %p414_p0 = pnand %p413_p13, %p407_p10 }
  0x21   :  { %417 = shalt.err (!%p414_p0)
}
  0x22   :  { %51 = dma.hbm_to_vmem [thread:$0]  %s551_s3, 256, %s46_s11, [#allocation6], %s467_s27, %s467_s27, %s468_s28  }
  0x23   :  { %s471_s17 = smov [#allocation8]  }
  0x24   :  { %s59_s18 = sshll.u32 %s471_s17, 4  ;;  %s60_s18 = int_to_ptr.vmem [resolvable:$true] %s59_s18 }
  0x25   :  { %s426_s19 = scalar_lea.vmem %s60_s18, 256  ;;  %p431_p2 = scmp.lt.s32.totalorder %s60_s18, %s60_s18 }
  0x26   :  { %p427_p1 = scmp.ne.s32.totalorder %s60_s18, %s426_s19  ;;  %p432_p3 = scmp.lt.s32.totalorder %s426_s19, %s426_s19 }
  0x28   :  { %p433_p4 = por %p432_p3, %p431_p2 }
  0x2a   :  { %p434_p5 = pnand %p433_p4, %p427_p1 }
  0x2c   :  { %437 = shalt.err (!%p434_p5)
}
  0x2d   :  { %65 = dma.hbm_to_vmem [thread:$0]  %s553_s5, 256, %s60_s18, [#allocation9], %s467_s27, %s467_s27, %s468_s28  }
  0x2e   :  { %458 = dma.done.wait [#allocation3], 128  }
  0x2f   :  { %459 = vsyncadd [#allocation3], 4294967168 }
  0x30   :  { %460 = dma.done.wait [#allocation6], 384  }
  0x31   :  { %461 = vsyncadd [#allocation6], 4294966912 }
  0x32   :  { %462 = dma.done.wait [#allocation9], 256  }
  0x33   :  { %463 = vsyncadd [#allocation9], 4294967040  ;;  %v472_v0 = vmov 0.0   ;;  %vm473_vm0 = vmmov 0   ;;  %v353_v1 = vld [vmem:[#allocation5] sm:$0xff]   ;;  %v81_v2 = vld [vmem:[#allocation2] sm:$0xff]  ;;  %v279_v24 = vlaneseq }
  0x34   :  { %322 = vmatprep.subr.bf16.mxu0 %v472_v0  ;;  %324 = vmatprep.mubr.msk.bf16.mxu0 %vm473_vm0, %v472_v0  ;;  %vm98_vm1 = vcmask 130048   ;;  %v82_v3 = vpack.c.bf16 %v81_v2, %v81_v2  ;;  %v354_v4 = vld [vmem:[#allocation7 + $0x8] sm:$0xff]   ;;  %v355_v5 = vld [vmem:[#allocation7] sm:$0xff]   ;;  %v356_v6 = vld [vmem:[#allocation8 + $0x8] sm:$0xff]   ;;  %vm167_vm2 = vcmask 261120   ;;  %s474_s24 = smov [#allocation10]  }
  0x35   :  { %328 = vmatprep.subr.bf16.mxu1 %v472_v0  ;;  %332 = vmatprep.mubr.msk.bf16.mxu1 %vm473_vm0, %v472_v0  ;;  %v303_v7 = vld [vmem:[%s550_s2] ss:$0 sm:$0xff]  ;;  %v280_v27 = vand.u32 127, %v279_v24 }
  0x36   :  { %323 = vmatpush3.bf16.msra.mxu0 %v353_v1  ;;  %329 = vmatpush3.bf16.msra.mxu1 %v354_v4  ;;  %v357_v15 = vld [vmem:[#allocation8] sm:$0xff]  }
  0x37   :  { %336 = vmatprep.subr.bf16.mxu0 %v472_v0  ;;  %330 = vmatprep.subr.bf16.mxu1 %v472_v0  ;;  %v306_v16 = vld [vmem:[%s552_s4] ss:$0 sm:$0xff]  ;;  %s292_s4 = sshll.u32 %s474_s24, 4  ;;  %vm281_vm3 = vcmp.ge.s32.totalorder %v280_v27, 4  ;;  %s293_s4 = int_to_ptr.vmem [resolvable:$true] %s292_s4 }
  0x38   :  { %v310_v25 = vld [vmem:[%s554_s6] ss:$0 sm:$0xff]  ;;  %s438_s25 = scalar_lea.vmem %s293_s4, 128  ;;  %p443_p7 = scmp.lt.s32.totalorder %s293_s4, %s293_s4 }
  0x39   :  { %325 = vmatmul.mubr.msk.bf16.vlgmr.msra.gmra.mxu0 %vm98_vm1, %v82_v3  ;;  %p439_p6 = scmp.ne.s32.totalorder %s293_s4, %s438_s25  ;;  %p444_p8 = scmp.lt.s32.totalorder %s438_s25, %s438_s25 }
  0x3a   :  { %340 = vmatprep.mubr.msk.bf16.mxu0 %vm473_vm0, %v472_v0  ;;  %331 = vmatpush3.bf16.msra.mxu1 %v355_v5 }
  0x3b   :  { %337 = vmatpush3.bf16.msra.mxu0 %v356_v6  ;;  %p445_p9 = por %p444_p8, %p443_p7 }
  0x3c   :  { %338 = vmatprep.subr.bf16.mxu0 %v472_v0 }
  0x3d   :  { %p446_p10 = pnand %p445_p9, %p439_p6 }
  0x3f   :  { %339 = vmatpush3.bf16.msra.mxu0 %v357_v15 }
  0xf9   :  { %v136_v8 = vpop.f32.mrf.mxu0 }
  0xfa   :  { %v137_v9 = vadd.f32 %v303_v7, %v136_v8 }
  0xfb   :  { %v326_v10 = vpop.f32.mrf.mxu0 }
  0xfc   :  { %v142_v11 = vmax.f32 %v137_v9, 0.0 }
  0xfd   :  { %v139_v12 = vpop.f32.mrf.mxu0 }
  0xfe   :  { %v143_v13 = vpack.c.bf16 %v142_v11, %v142_v11 }
  0xff   :  { %v327_v14 = vpop.f32.mrf.mxu0 }
 0x100   :  { %333 = vmatmul.mubr.msk.bf16.vlgmr.msra.gmra.mxu1 %vm167_vm2, %v143_v13 }
 0x1c0   :  { %v205_v17 = vpop.f32.mrf.mxu1 }
 0x1c1   :  { %v206_v18 = vadd.f32 %v306_v16, %v205_v17 }
 0x1c2   :  { %v334_v19 = vpop.f32.mrf.mxu1 }
 0x1c3   :  { %v211_v20 = vmax.f32 %v206_v18, 0.0 }
 0x1c4   :  { %v208_v21 = vpop.f32.mrf.mxu1 }
 0x1c5   :  { %v212_v22 = vpack.c.bf16 %v211_v20, %v211_v20 }
 0x1c6   :  { %v335_v23 = vpop.f32.mrf.mxu1 }
 0x1c7   :  { %341 = vmatmul.mubr.msk.bf16.vlgmr.msra.gmra.mxu0 %vm167_vm2, %v212_v22 }
 0x287   :  { %v273_v26 = vpop.f32.mrf.mxu0 }
 0x288   :  { %v274_v28 = vadd.f32 %v310_v25, %v273_v26 }
 0x289   :  { %v342_v29 = vpop.f32.mrf.mxu0 }
 0x28a   :  { %v282_v30 = vmax.f32 %v274_v28, -20.0 }
 0x28b   :  { %v276_v31 = vpop.f32.mrf.mxu0 }
 0x28c   :  { %v283_v32 = vmin.f32 %v282_v30, 2.0 }
 0x28d   :  { %v343_v33 = vpop.f32.mrf.mxu0 }
 0x28e   :  { %v284_v34 = vsel %vm281_vm3, %v283_v32, %v274_v28 }
 0x28f   :  { %285 = vst [vmem:[#allocation10] sm:$0xff] %v284_v34 }
 0x290   :  { %449 = shalt.err (!%p446_p10)
}
 0x291   :  { %295 = dma.vmem_to_hbm [thread:$0]  %s293_s4, 128, %s555_s7, [#allocation4]  }
 0x292   :  { %464 = dma.done.wait [#allocation4], 128  }
 0x293   :  { %465 = vsyncadd [#allocation4], 4294967168 }
 0x294   :  { %299 = vsyncpa [#allocation3], 1 }
 0x295   :  { %300 = vsyncpa [#allocation6], 1 }
 0x296   :  { %301 = vsyncpa [#allocation9], 1 }
 0x297   :  { %302 = vsyncpa [#allocation4], 1 }

</bundles_post_ra>
